<compile_context>
chip_gen: v7x
topology: tpu7x:2x2x1
jax: 0.10.0
libtpu: 0.0.40
codegen_flags: <defaults>
</compile_context>

<pallas_src>
import functools

import jax
import jax.numpy as jnp
from jax.experimental import pallas as pl
from jax.experimental.pallas import tpu as pltpu

_LANE = 128


def _round_up(v: int, m: int) -> int:
    return (v + m - 1) // m * m


def _pick_tile(n: int, cap: int) -> int:
    """Largest multiple of 128 that divides n and is <= cap."""
    best = _LANE
    t = _LANE
    while t <= min(cap, n):
        if n % t == 0:
            best = t
        t += _LANE
    return best


def _vmem_capacity_bytes() -> int:
    try:
        cap = int(pltpu.get_tpu_info().vmem_capacity_bytes)
        if cap > 0:
            return cap
    except Exception:
        pass
    return 64 * 1024 * 1024  # conservative (v7x per-TensorCore VMEM)


# ----------------------------------------------------------------------------
# Path A: fully fused, VMEM-resident kernel (small / medium graphs).
#   refs = [a, x, W_0, ..., W_{L-1}, bias_stack, out]
#   a          : (Np, Np)              bf16   normalized adjacency (zero padded)
#   x          : (Np, Fp_0)            bf16   node features (zero padded)
#   W_l        : (Fp_l, Fp_{l+1})      bf16   per-layer padded weights
#   bias_stack : (L, max(Fp_{l+1}))    f32    stacked biases (zero padded)
#   out        : (Np, Fp_L)            f32
# ----------------------------------------------------------------------------
def _fused_gnn_kernel(*refs, num_layers: int, agg_first: tuple):
    a_ref, x_ref = refs[0], refs[1]
    w_refs = refs[2:2 + num_layers]
    b_ref = refs[2 + num_layers]
    o_ref = refs[3 + num_layers]

    a = a_ref[...]              # bf16 Â, resident across all layers
    b_all = b_ref[...]          # (L, Fmax) f32, loaded once
    h = x_ref[...]              # bf16 activations, never round-trip HBM
    for l in range(num_layers):
        w = w_refs[l][...]
        fop = w.shape[1]
        b = b_all[l:l + 1, :fop]                       # (1, fop) f32
        if agg_first[l]:
            # F_in < F_out: aggregate first so the N^2 matmul sees the narrow width.
            ah = jnp.dot(a, h, preferred_element_type=jnp.float32)
            out = jnp.dot(ah.astype(jnp.bfloat16), w,
                          preferred_element_type=jnp.float32)
        else:
            hw = jnp.dot(h, w, preferred_element_type=jnp.float32)
            out = jnp.dot(a, hw.astype(jnp.bfloat16),
                          preferred_element_type=jnp.float32)
        out = out + b                                  # f32 epilogue (v5e-safe)
        if l < num_layers - 1:
            h = jnp.maximum(out, 0.0).astype(jnp.bfloat16)
        else:
            o_ref[...] = out                           # lane-dense unmasked store


def _fused_gnn_call(a_hat, x, weights, bias_stack, agg_first, *, vmem_limit, cost):
    num_layers = len(weights)
    n_pad = a_hat.shape[0]
    f_last = weights[-1].shape[1]
    operands = [a_hat, x, *weights, bias_stack]
    kernel = functools.partial(_fused_gnn_kernel,
                               num_layers=num_layers,
                               agg_first=tuple(agg_first))
    return pl.pallas_call(
        kernel,
        out_shape=jax.ShapeDtypeStruct((n_pad, f_last), jnp.float32),
        in_specs=[pl.BlockSpec(memory_space=pltpu.MemorySpace.VMEM)
                  for _ in operands],
        out_specs=pl.BlockSpec(memory_space=pltpu.MemorySpace.VMEM),
        compiler_params=pltpu.CompilerParams(vmem_limit_bytes=int(vmem_limit)),
        cost_estimate=cost,
    )(*operands)


# ----------------------------------------------------------------------------
# Path B: per-layer tiled / streamed kernels (large graphs; Â never fully resident).
# ----------------------------------------------------------------------------
def _hw_matmul_kernel(h_ref, w_ref, o_ref):
    o_ref[...] = jnp.dot(h_ref[...], w_ref[...],
                         preferred_element_type=jnp.float32).astype(o_ref.dtype)


def _hw_matmul(h, w, *, tm):
    """Z = H @ W (row-tiled), bf16 output for the subsequent aggregation."""
    n_pad, f_in = h.shape
    f_out = w.shape[1]
    return pl.pallas_call(
        _hw_matmul_kernel,
        out_shape=jax.ShapeDtypeStruct((n_pad, f_out), jnp.bfloat16),
        grid_spec=pltpu.PrefetchScalarGridSpec(
            num_scalar_prefetch=0,
            grid=(n_pad // tm,),
            in_specs=[pl.BlockSpec((tm, f_in), lambda i: (i, 0)),
                      pl.BlockSpec((f_in, f_out), lambda i: (0, 0))],
            out_specs=pl.BlockSpec((tm, f_out), lambda i: (i, 0))),
        compiler_params=pltpu.CompilerParams(
            dimension_semantics=("parallel",),
            vmem_limit_bytes=32 * 1024 * 1024),
    )(h, w)


def _agg_layer_kernel(*refs, apply_w: bool, relu: bool):
    if apply_w:
        a_ref, z_ref, w_ref, b_ref, o_ref, acc_ref = refs
    else:
        a_ref, z_ref, b_ref, o_ref, acc_ref = refs
        w_ref = None
    k = pl.program_id(1)

    @pl.when(k == 0)
    def _():
        acc_ref[...] = jnp.zeros_like(acc_ref)

    acc_ref[...] += jnp.dot(a_ref[...], z_ref[...],
                            preferred_element_type=jnp.float32)

    @pl.when(k == pl.num_programs(1) - 1)
    def _():
        out = acc_ref[...]
        if apply_w:
            out = jnp.dot(out.astype(jnp.bfloat16), w_ref[...],
                          preferred_element_type=jnp.float32)
        out = out + b_ref[...]                         # f32 epilogue
        if relu:
            out = jnp.maximum(out, 0.0)
        o_ref[...] = out.astype(o_ref.dtype)


def _tiled_gcn_layer(a_hat, h, w, b, *, agg_first, relu, out_dtype, tm, tk):
    n_pad = a_hat.shape[0]
    f_in, f_out = w.shape

    if agg_first:
        z, f_z = h, f_in                       # aggregate the narrow H, apply W in finalize
        operands = [a_hat, z, w, b]
        in_specs = [pl.BlockSpec((tm, tk), lambda i, k: (i, k)),
                    pl.BlockSpec((tk, f_z), lambda i, k: (k, 0)),
                    pl.BlockSpec((f_in, f_out), lambda i, k: (0, 0)),
                    pl.BlockSpec((1, f_out), lambda i, k: (0, 0))]
    else:
        z = _hw_matmul(h, w, tm=tm)            # (Np, f_out) bf16, narrow operand
        f_z = f_out
        operands = [a_hat, z, b]
        in_specs = [pl.BlockSpec((tm, tk), lambda i, k: (i, k)),
                    pl.BlockSpec((tk, f_z), lambda i, k: (k, 0)),
                    pl.BlockSpec((1, f_out), lambda i, k: (0, 0))]

    kernel = functools.partial(_agg_layer_kernel, apply_w=agg_first, relu=relu)
    flops = 2 * n_pad * n_pad * f_z + (2 * n_pad * f_in * f_out if agg_first else 0)
    bytes_accessed = (2 * n_pad * n_pad + 2 * n_pad * (f_in + f_out)
                      + 2 * f_in * f_out + 4 * n_pad * f_out)
    return pl.pallas_call(
        kernel,
        out_shape=jax.ShapeDtypeStruct((n_pad, f_out), out_dtype),
        grid_spec=pltpu.PrefetchScalarGridSpec(
            num_scalar_prefetch=0,
            grid=(n_pad // tm, n_pad // tk),
            in_specs=in_specs,
            out_specs=pl.BlockSpec((tm, f_out), lambda i, k: (i, 0)),
            scratch_shapes=[pltpu.VMEM((tm, f_z), jnp.float32)]),
        compiler_params=pltpu.CompilerParams(
            dimension_semantics=("parallel", "arbitrary"),
            vmem_limit_bytes=32 * 1024 * 1024),
        cost_estimate=pl.CostEstimate(flops=int(flops), transcendentals=0,
                                      bytes_accessed=int(bytes_accessed)),
    )(*operands)


# ----------------------------------------------------------------------------
# Glue: dense normalized adjacency built directly into the padded bf16 buffer.
# Matches PyG gcn_norm + add_remaining_self_loops: existing self-loops dropped,
# a single weight-1 loop added per node, duplicate (non-self) edges accumulate.
# ----------------------------------------------------------------------------
def build_normalized_adj_padded(edge_index, num_nodes, n_pad, dtype=jnp.bfloat16):
    src, dst = edge_index[0], edge_index[1]
    a = jnp.zeros((n_pad, n_pad), jnp.float32)
    vals = jnp.where(src == dst, 0.0, 1.0)          # drop existing self-loops
    a = a.at[dst, src].add(vals)                    # messages flow src -> dst
    diag = jnp.arange(num_nodes)
    a = a.at[diag, diag].set(1.0)                   # one weight-1 self-loop per node
    deg = a.sum(axis=1)
    d_inv_sqrt = jnp.where(deg > 0.0, jax.lax.rsqrt(jnp.maximum(deg, 1e-12)), 0.0)
    return (d_inv_sqrt[:, None] * a * d_inv_sqrt[None, :]).astype(dtype)


# ----------------------------------------------------------------------------
# Glue: deterministic parameter init (glorot-uniform weights, zero bias).
# ----------------------------------------------------------------------------
def init_gnn_params(layer_sizes, key):
    params = []
    for i in range(len(layer_sizes) - 1):
        f_in, f_out = layer_sizes[i], layer_sizes[i + 1]
        key, wkey = jax.random.split(key)
        limit = jnp.sqrt(6.0 / (f_in + f_out))
        w = jax.random.uniform(wkey, (f_in, f_out), jnp.float32,
                               minval=-limit, maxval=limit)
        b = jnp.zeros((1, f_out), jnp.float32)
        params.append((w, b))
    return params


# ----------------------------------------------------------------------------
# Forward: pad, build Â, dispatch between the fused-resident and tiled paths.
# ----------------------------------------------------------------------------
def gnn_forward(x, edge_index, params, force_tiled: bool = False):
    num_nodes, f_in0 = x.shape
    num_layers = len(params)
    f_dims = [f_in0] + [w.shape[1] for (w, _) in params]
    f_pads = [_round_up(f, _LANE) for f in f_dims]
    n_pad = _round_up(num_nodes, _LANE)

    # Â directly into the padded buffer, single bf16 cast (no redundant N^2 passes).
    a_hat = build_normalized_adj_padded(edge_index, num_nodes, n_pad)

    x_p = (jnp.zeros((n_pad, f_pads[0]), jnp.bfloat16)
           .at[:num_nodes, :f_in0].set(x.astype(jnp.bfloat16)))

    weights = []
    for l, (w, _) in enumerate(params):
        fi, fo = w.shape
        weights.append(jnp.zeros((f_pads[l], f_pads[l + 1]), jnp.bfloat16)
                       .at[:fi, :fo].set(w.astype(jnp.bfloat16)))

    max_fo_pad = max(f_pads[1:])
    bias_stack = jnp.zeros((num_layers, max_fo_pad), jnp.float32)
    for l, (_, b) in enumerate(params):
        fo = b.size
        bias_stack = bias_stack.at[l, :fo].set(b.reshape(-1))

    # Reassociation decided on *padded* per-layer widths.
    agg_first = tuple(f_pads[l] < f_pads[l + 1] for l in range(num_layers))

    # --- VMEM sizing / generation-aware dispatch ---
    op_bytes = (2 * n_pad * n_pad
                + 2 * n_pad * f_pads[0]
                + sum(2 * f_pads[l] * f_pads[l + 1] for l in range(num_layers))
                + 4 * num_layers * max_fo_pad
                + 4 * n_pad * f_pads[-1])
    scratch_bytes = 6 * n_pad * max(f_pads)          # f32 temporaries / bf16 activations
    needed = op_bytes + scratch_bytes
    cap = _vmem_capacity_bytes()
    use_resident = (not force_tiled) and (needed <= int(cap * 0.85))

    if use_resident:
        flops = 0
        for l in range(num_layers):
            fi, fo = f_pads[l], f_pads[l + 1]
            flops += 2 * n_pad * n_pad * min(fi, fo) + 2 * n_pad * fi * fo
        cost = pl.CostEstimate(flops=int(flops), transcendentals=0,
                               bytes_accessed=int(op_bytes))
        vmem_limit = int(min(max(needed * 1.3 + (16 << 20), 32 << 20), cap * 0.95))
        out_p = _fused_gnn_call(a_hat, x_p, weights, bias_stack, agg_first,
                                vmem_limit=vmem_limit, cost=cost)
    else:
        # Streamed / tiled per-layer path: Â pipelined from HBM in (tm, tk) tiles.
        tm = _pick_tile(n_pad, 256)
        tk = _pick_tile(n_pad, 512)
        h = x_p
        for l in range(num_layers):
            last = (l == num_layers - 1)
            b_l = bias_stack[l:l + 1, :f_pads[l + 1]]
            h = _tiled_gcn_layer(a_hat, h, weights[l], b_l,
                                 agg_first=agg_first[l], relu=not last,
                                 out_dtype=jnp.float32 if last else jnp.bfloat16,
                                 tm=tm, tk=tk)
        out_p = h

    return out_p[:num_nodes, :f_dims[-1]]


# ----------------------------------------------------------------------------
if __name__ == "__main__":
    key = jax.random.PRNGKey(0)
    k_x, k_e, k_p = jax.random.split(key, 3)

    num_nodes = 16
    num_edges = 40
    layer_sizes = [8, 32, 16, 4]

    # node features (N, F_in)
    x = jax.random.normal(k_x, (num_nodes, layer_sizes[0]), jnp.float32)
    # edge_index (2, E): row 0 = src, row 1 = dst
    edge_index = jax.random.randint(k_e, (2, num_edges), 0, num_nodes, jnp.int32)

    params = init_gnn_params(layer_sizes, k_p)

    fwd_resident = jax.jit(functools.partial(gnn_forward, force_tiled=False))
    fwd_tiled = jax.jit(functools.partial(gnn_forward, force_tiled=True))

    out = jax.block_until_ready(fwd_resident(x, edge_index, params))
    out_tiled = jax.block_until_ready(fwd_tiled(x, edge_index, params))

    assert out.shape == (num_nodes, layer_sizes[-1])
    assert out.dtype == jnp.float32
    assert bool(jnp.all(jnp.isfinite(out)))
    assert bool(jnp.all(jnp.isfinite(out_tiled)))
    # Both paths perform identical bf16 math; they must agree closely.
    assert float(jnp.max(jnp.abs(out - out_tiled))) < 5e-2
    print("KERNEL_OK")
</pallas_src>

<mosaic_0001>
module attributes {stable_mosaic.version = 11 : i64} {
  func.func @_fused_gnn_kernel(%arg0: memref<128x128xbf16, #tpu.memory_space<vmem>>, %arg1: memref<128x128xbf16, #tpu.memory_space<vmem>>, %arg2: memref<128x128xbf16, #tpu.memory_space<vmem>>, %arg3: memref<128x128xbf16, #tpu.memory_space<vmem>>, %arg4: memref<128x128xbf16, #tpu.memory_space<vmem>>, %arg5: memref<3x128xf32, #tpu.memory_space<vmem>>, %arg6: memref<128x128xf32, #tpu.memory_space<vmem>>) attributes {dimension_semantics = [], scalar_prefetch = 0 : i64, scratch_operands = 0 : i64, tpu.core_type = #tpu.core_type<tc>} {
    %c0 = arith.constant 0 : index
    %c0_0 = arith.constant 0 : index
    %0 = vector.load %arg0[%c0, %c0_0] : memref<128x128xbf16, #tpu.memory_space<vmem>>, vector<128x128xbf16>
    %c0_1 = arith.constant 0 : index
    %c0_2 = arith.constant 0 : index
    %1 = vector.load %arg5[%c0_1, %c0_2] : memref<3x128xf32, #tpu.memory_space<vmem>>, vector<3x128xf32>
    %c0_3 = arith.constant 0 : index
    %c0_4 = arith.constant 0 : index
    %2 = vector.load %arg1[%c0_3, %c0_4] : memref<128x128xbf16, #tpu.memory_space<vmem>>, vector<128x128xbf16>
    %c0_5 = arith.constant 0 : index
    %c0_6 = arith.constant 0 : index
    %3 = vector.load %arg2[%c0_5, %c0_6] : memref<128x128xbf16, #tpu.memory_space<vmem>>, vector<128x128xbf16>
    %4 = vector.extract_strided_slice %1 {offsets = [0, 0], sizes = [1, 128], strides = [1, 1]} : vector<3x128xf32> to vector<1x128xf32>
    %cst = arith.constant dense<0.000000e+00> : vector<128x128xf32>
    %5 = tpu.matmul %2, %3, %cst {dimension_numbers = #tpu.dot_dimension_numbers<[1], [0], [0], [1], [0, 0, 1, 1], [], []>} : vector<128x128xbf16>, vector<128x128xbf16>, vector<128x128xf32> -> vector<128x128xf32>
    %6 = arith.truncf %5 : vector<128x128xf32> to vector<128x128xbf16>
    %cst_7 = arith.constant dense<0.000000e+00> : vector<128x128xf32>
    %7 = tpu.matmul %0, %6, %cst_7 {dimension_numbers = #tpu.dot_dimension_numbers<[1], [0], [0], [1], [0, 0, 1, 1], [], []>} : vector<128x128xbf16>, vector<128x128xbf16>, vector<128x128xf32> -> vector<128x128xf32>
    %8 = vector.broadcast %4 : vector<1x128xf32> to vector<128x128xf32>
    %9 = arith.addf %7, %8 : vector<128x128xf32>
    %cst_8 = arith.constant 0.000000e+00 : f32
    %10 = vector.broadcast %cst_8 : f32 to vector<128x128xf32>
    %11 = arith.maximumf %9, %10 : vector<128x128xf32>
    %12 = arith.truncf %11 : vector<128x128xf32> to vector<128x128xbf16>
    %c0_9 = arith.constant 0 : index
    %c0_10 = arith.constant 0 : index
    %13 = vector.load %arg3[%c0_9, %c0_10] : memref<128x128xbf16, #tpu.memory_space<vmem>>, vector<128x128xbf16>
    %14 = vector.extract_strided_slice %1 {offsets = [1, 0], sizes = [1, 128], strides = [1, 1]} : vector<3x128xf32> to vector<1x128xf32>
    %cst_11 = arith.constant dense<0.000000e+00> : vector<128x128xf32>
    %15 = tpu.matmul %12, %13, %cst_11 {dimension_numbers = #tpu.dot_dimension_numbers<[1], [0], [0], [1], [0, 0, 1, 1], [], []>} : vector<128x128xbf16>, vector<128x128xbf16>, vector<128x128xf32> -> vector<128x128xf32>
    %16 = arith.truncf %15 : vector<128x128xf32> to vector<128x128xbf16>
    %cst_12 = arith.constant dense<0.000000e+00> : vector<128x128xf32>
    %17 = tpu.matmul %0, %16, %cst_12 {dimension_numbers = #tpu.dot_dimension_numbers<[1], [0], [0], [1], [0, 0, 1, 1], [], []>} : vector<128x128xbf16>, vector<128x128xbf16>, vector<128x128xf32> -> vector<128x128xf32>
    %18 = vector.broadcast %14 : vector<1x128xf32> to vector<128x128xf32>
    %19 = arith.addf %17, %18 : vector<128x128xf32>
    %cst_13 = arith.constant 0.000000e+00 : f32
    %20 = vector.broadcast %cst_13 : f32 to vector<128x128xf32>
    %21 = arith.maximumf %19, %20 : vector<128x128xf32>
    %22 = arith.truncf %21 : vector<128x128xf32> to vector<128x128xbf16>
    %c0_14 = arith.constant 0 : index
    %c0_15 = arith.constant 0 : index
    %23 = vector.load %arg4[%c0_14, %c0_15] : memref<128x128xbf16, #tpu.memory_space<vmem>>, vector<128x128xbf16>
    %24 = vector.extract_strided_slice %1 {offsets = [2, 0], sizes = [1, 128], strides = [1, 1]} : vector<3x128xf32> to vector<1x128xf32>
    %cst_16 = arith.constant dense<0.000000e+00> : vector<128x128xf32>
    %25 = tpu.matmul %22, %23, %cst_16 {dimension_numbers = #tpu.dot_dimension_numbers<[1], [0], [0], [1], [0, 0, 1, 1], [], []>} : vector<128x128xbf16>, vector<128x128xbf16>, vector<128x128xf32> -> vector<128x128xf32>
    %26 = arith.truncf %25 : vector<128x128xf32> to vector<128x128xbf16>
    %cst_17 = arith.constant dense<0.000000e+00> : vector<128x128xf32>
    %27 = tpu.matmul %0, %26, %cst_17 {dimension_numbers = #tpu.dot_dimension_numbers<[1], [0], [0], [1], [0, 0, 1, 1], [], []>} : vector<128x128xbf16>, vector<128x128xbf16>, vector<128x128xf32> -> vector<128x128xf32>
    %28 = vector.broadcast %24 : vector<1x128xf32> to vector<128x128xf32>
    %29 = arith.addf %27, %28 : vector<128x128xf32>
    %c0_18 = arith.constant 0 : index
    %c0_19 = arith.constant 0 : index
    %30 = vector.load %arg6[%c0_18, %c0_19] : memref<128x128xf32, #tpu.memory_space<vmem>>, vector<128x128xf32>
    tpu.vector_store %arg6[%c0_18, %c0_19], %29 {strides = array<i32>} : memref<128x128xf32, #tpu.memory_space<vmem>>, vector<128x128xf32>,
    return
  }
}

</mosaic_0001>

<bundles_post_ra>
// kernel: gnn_forward.1
= control target key start
LH: loop header
LB: loop body
LE: loop exit
PB: predicated region body
PF: predicated region fallthrough
CT: control target
= control target key end

     0   :  { %v274_v56 = vlaneseq  ;;  %s1655_s2 = inlined_call_operand.vmem [shape: bf16[128,128], index: 2, kind: input, shape index: {}]   ;;  %s1656_s1 = inlined_call_operand.vmem [shape: bf16[128,128], index: 1, kind: input, shape index: {}]   ;;  %s1657_s0 = inlined_call_operand.vmem [shape: bf16[128,128], index: 0, kind: input, shape index: {}]   ;;  %s1658_s3 = inlined_call_operand.vmem [shape: bf16[128,128], index: 3, kind: input, shape index: {}]   ;;  %s1659_s5 = inlined_call_operand.vmem [shape: f32[3,128], index: 5, kind: input, shape index: {}]   ;;  %s1660_s4 = inlined_call_operand.vmem [shape: bf16[128,128], index: 4, kind: input, shape index: {}]   ;;  %s1661_s6 = inlined_call_operand.vmem [shape: f32[128,128], index: 6, kind: output, shape index: {}]  }
   0x1   :  { %v1359_v0 = vld [vmem:[%s1655_s2] sm:$0xff]   ;;  %v1360_v1 = vld [vmem:[%s1655_s2 + $0x8] sm:$0xff]   ;;  %v1361_v2 = vld [vmem:[%s1655_s2 + $0x10] sm:$0xff]  }
   0x2   :  { %1167 = vmatprep.subr.bf16.mxu0 %v1359_v0  ;;  %v1362_v3 = vld [vmem:[%s1655_s2 + $0x18] sm:$0xff]   ;;  %v1367_v4 = vld [vmem:[%s1656_s1] sm:$0xff]   ;;  %v1364_v6 = vld [vmem:[%s1655_s2 + $0x28] sm:$0xff]   ;;  %v1555_v57 = vshrl.u32 %v274_v56, 7 }
   0x3   :  { %1168 = vmatpush3.bf16.msra.mxu0 %v1359_v0  ;;  %1183 = vmatprep.mubr.bf16.mxu0 %v1367_v4  ;;  %v1363_v5 = vld [vmem:[%s1655_s2 + $0x20] sm:$0xff]   ;;  %v1365_v7 = vld [vmem:[%s1655_s2 + $0x30] sm:$0xff]   ;;  %v1366_v8 = vld [vmem:[%s1655_s2 + $0x38] sm:$0xff]  }
   0x4   :  { %1169 = vmatprep.subr.bf16.mxu0 %v1360_v1  ;;  %v1368_v9 = vld [vmem:[%s1656_s1 + $0x8] sm:$0xff]   ;;  %v1369_v10 = vld [vmem:[%s1656_s1 + $0x10] sm:$0xff]   ;;  %v1370_v11 = vld [vmem:[%s1656_s1 + $0x18] sm:$0xff]   ;;  %v276_v58 = vsub.s32 0, %v1555_v57 }
   0x5   :  { %v1371_v12 = vld [vmem:[%s1656_s1 + $0x20] sm:$0xff]   ;;  %v1372_v13 = vld [vmem:[%s1656_s1 + $0x28] sm:$0xff]   ;;  %v1373_v14 = vld [vmem:[%s1656_s1 + $0x30] sm:$0xff]  }
   0x6   :  { %v1374_v15 = vld [vmem:[%s1656_s1 + $0x38] sm:$0xff]   ;;  %v1485_v16 = vld [vmem:[%s1657_s0] sm:$0xff]   ;;  %v1384_v18 = vld [vmem:[%s1658_s3 + $0x8] sm:$0xff]  }
   0x7   :  { %1170 = vmatpush3.bf16.msra.mxu0 %v1360_v1  ;;  %1215 = vmatprep.mubr.bf16.mxu1 %v1485_v16  ;;  %v1383_v17 = vld [vmem:[%s1658_s3] sm:$0xff]   ;;  %v1385_v19 = vld [vmem:[%s1658_s3 + $0x10] sm:$0xff]   ;;  %v1386_v20 = vld [vmem:[%s1658_s3 + $0x18] sm:$0xff]  }
   0x8   :  { %1171 = vmatprep.subr.bf16.mxu0 %v1361_v2  ;;  %v1387_v21 = vld [vmem:[%s1658_s3 + $0x20] sm:$0xff]   ;;  %v1388_v22 = vld [vmem:[%s1658_s3 + $0x28] sm:$0xff]   ;;  %v1514_v48 = vld [vmem:[%s1657_s0 + $0x10] sm:$0xff]  }
   0x9   :  { %v1509_v47 = vld [vmem:[%s1657_s0 + $0x8] sm:$0xff]   ;;  %v1521_v49 = vld [vmem:[%s1657_s0 + $0x18] sm:$0xff]   ;;  %v1526_v50 = vld [vmem:[%s1657_s0 + $0x20] sm:$0xff]  }
   0xa   :  { %v1533_v51 = vld [vmem:[%s1657_s0 + $0x28] sm:$0xff]   ;;  %v1538_v52 = vld [vmem:[%s1657_s0 + $0x30] sm:$0xff]   ;;  %v1545_v53 = vld [vmem:[%s1657_s0 + $0x38] sm:$0xff]  }
   0xb   :  { %1172 = vmatpush3.bf16.msra.mxu0 %v1361_v2  ;;  %v1389_v54 = vld [vmem:[%s1658_s3 + $0x30] sm:$0xff]   ;;  %v1390_v55 = vld [vmem:[%s1658_s3 + $0x38] sm:$0xff]   ;;  %v1561_v59 = vld [vmem:[%s1659_s5] sm:$0x7] }
   0xc   :  { %1173 = vmatprep.subr.bf16.mxu0 %v1362_v3  ;;  %v277_v60 = vrot.slane %v1561_v59, %v276_v58 }
   0xf   :  { %1174 = vmatpush3.bf16.msra.mxu0 %v1362_v3 }
  0x10   :  { %1175 = vmatprep.subr.bf16.mxu0 %v1363_v5 }
  0x13   :  { %1176 = vmatpush3.bf16.msra.mxu0 %v1363_v5 }
  0x14   :  { %1177 = vmatprep.subr.bf16.mxu0 %v1364_v6 }
  0x17   :  { %1178 = vmatpush3.bf16.msra.mxu0 %v1364_v6 }
  0x18   :  { %1179 = vmatprep.subr.bf16.mxu0 %v1365_v7 }
  0x1b   :  { %1180 = vmatpush3.bf16.msra.mxu0 %v1365_v7 }
  0x1c   :  { %1181 = vmatprep.subr.bf16.mxu0 %v1366_v8 }
  0x1f   :  { %1182 = vmatpush3.bf16.msra.mxu0 %v1366_v8 }
  0x20   :  { %1231 = vmatprep.subr.bf16.mxu0 %v1383_v17 }
  0x22   :  { %1184 = vmatmul.mubr.bf16.vlgmr.msra.gmra.mrb[0].mxu0 %v1368_v9 }
  0x23   :  { %1187 = vmatprep.mubr.bf16.mxu0 %v1369_v10  ;;  %1232 = vmatpush3.bf16.msra.mxu0 %v1383_v17 }
  0x24   :  { %1233 = vmatprep.subr.bf16.mxu0 %v1384_v18 }
  0x27   :  { %1234 = vmatpush3.bf16.msra.mxu0 %v1384_v18 }
  0x28   :  { %1235 = vmatprep.subr.bf16.mxu0 %v1385_v19 }
  0x2a   :  { %1188 = vmatmul.mubr.bf16.gmra.mrb[4].mxu0 %v1370_v11 }
  0x2b   :  { %1191 = vmatprep.mubr.bf16.mxu0 %v1371_v12  ;;  %1236 = vmatpush3.bf16.msra.mxu0 %v1385_v19 }
  0x2c   :  { %1237 = vmatprep.subr.bf16.mxu0 %v1386_v20 }
  0x2f   :  { %1238 = vmatpush3.bf16.msra.mxu0 %v1386_v20 }
  0x30   :  { %1239 = vmatprep.subr.bf16.mxu0 %v1387_v21 }
  0x32   :  { %1192 = vmatmul.mubr.bf16.gmra.mrb[8].mxu0 %v1372_v13 }
  0x33   :  { %1195 = vmatprep.mubr.bf16.mxu0 %v1373_v14  ;;  %1240 = vmatpush3.bf16.msra.mxu0 %v1387_v21 }
  0x34   :  { %1241 = vmatprep.subr.bf16.mxu0 %v1388_v22 }
  0x37   :  { %1242 = vmatpush3.bf16.msra.mxu0 %v1388_v22 }
  0x38   :  { %1243 = vmatprep.subr.bf16.mxu0 %v1389_v54 }
  0x3a   :  { %1196 = vmatmul.mubr.bf16.gmra.mrb[12].mxu0 %v1374_v15 }
  0x3b   :  { %1244 = vmatpush3.bf16.msra.mxu0 %v1389_v54 }
  0x3c   :  { %1245 = vmatprep.subr.bf16.mxu0 %v1390_v55 }
  0x3f   :  { %1246 = vmatpush3.bf16.msra.mxu0 %v1390_v55 }
  0xf5   :  { %v1185_v23 = vpop.f32.mrb[0].mxu0 }
  0xf6   :  { %v203_v24 = vpop.f32.mrb[1].mxu0 }
  0xf7   :  { %v1186_v25 = vpop.f32.mrb[2].mxu0 }
  0xf8   :  { %v267_v26 = vpack.c.bf16 %v1186_v25, %v1185_v23  ;;  %v206_v27 = vpop.f32.mrb[3].mxu0 }
  0xf9   :  { %v266_v28 = vpack.c.bf16 %v206_v27, %v203_v24 }
  0xfb   :  { %1199 = vmatprep.subr.bf16.mxu1 %v266_v28 }
  0xfc   :  { %1200 = vmatpush3.bf16.msra.mxu1 %v266_v28 }
  0xfd   :  { %v1189_v29 = vpop.f32.mrb[4].mxu0  ;;  %1201 = vmatprep.subr.bf16.mxu1 %v267_v26 }
  0xfe   :  { %v219_v30 = vpop.f32.mrb[5].mxu0 }
  0xff   :  { %v1190_v31 = vpop.f32.mrb[6].mxu0 }
 0x100   :  { %v269_v32 = vpack.c.bf16 %v1190_v31, %v1189_v29  ;;  %v222_v33 = vpop.f32.mrb[7].mxu0  ;;  %1202 = vmatpush3.bf16.msra.mxu1 %v267_v26 }
 0x101   :  { %v268_v34 = vpack.c.bf16 %v222_v33, %v219_v30 }
 0x103   :  { %1203 = vmatprep.subr.bf16.mxu1 %v268_v34 }
 0x104   :  { %1204 = vmatpush3.bf16.msra.mxu1 %v268_v34 }
 0x105   :  { %v1193_v35 = vpop.f32.mrb[8].mxu0  ;;  %1205 = vmatprep.subr.bf16.mxu1 %v269_v32 }
 0x106   :  { %v235_v36 = vpop.f32.mrb[9].mxu0 }
 0x107   :  { %v1194_v37 = vpop.f32.mrb[10].mxu0 }
 0x108   :  { %v271_v38 = vpack.c.bf16 %v1194_v37, %v1193_v35  ;;  %v238_v39 = vpop.f32.mrb[11].mxu0  ;;  %1206 = vmatpush3.bf16.msra.mxu1 %v269_v32 }
 0x109   :  { %v270_v40 = vpack.c.bf16 %v238_v39, %v235_v36 }
 0x10b   :  { %1207 = vmatprep.subr.bf16.mxu1 %v270_v40 }
 0x10c   :  { %1208 = vmatpush3.bf16.msra.mxu1 %v270_v40 }
 0x10d   :  { %v1197_v41 = vpop.f32.mrb[12].mxu0  ;;  %1209 = vmatprep.subr.bf16.mxu1 %v271_v38 }
 0x10e   :  { %v251_v42 = vpop.f32.mrb[13].mxu0 }
 0x10f   :  { %v1198_v43 = vpop.f32.mrb[14].mxu0 }
 0x110   :  { %v273_v44 = vpack.c.bf16 %v1198_v43, %v1197_v41  ;;  %v254_v45 = vpop.f32.mrb[15].mxu0  ;;  %1210 = vmatpush3.bf16.msra.mxu1 %v271_v38 }
 0x111   :  { %v272_v46 = vpack.c.bf16 %v254_v45, %v251_v42 }
 0x113   :  { %1211 = vmatprep.subr.bf16.mxu1 %v272_v46 }
 0x114   :  { %1212 = vmatpush3.bf16.msra.mxu1 %v272_v46 }
 0x115   :  { %1213 = vmatprep.subr.bf16.mxu1 %v273_v44 }
 0x118   :  { %1214 = vmatpush3.bf16.msra.mxu1 %v273_v44 }
 0x11b   :  { %1216 = vmatmul.mubr.bf16.vlgmr.msra.gmra.mrb[0].mxu1 %v1509_v47 }
 0x11c   :  { %1219 = vmatprep.mubr.bf16.mxu1 %v1514_v48 }
 0x123   :  { %1220 = vmatmul.mubr.bf16.gmra.mrb[4].mxu1 %v1521_v49 }
 0x124   :  { %1223 = vmatprep.mubr.bf16.mxu1 %v1526_v50 }
 0x12b   :  { %1224 = vmatmul.mubr.bf16.gmra.mrb[8].mxu1 %v1533_v51 }
 0x12c   :  { %1227 = vmatprep.mubr.bf16.mxu1 %v1538_v52 }
 0x133   :  { %1228 = vmatmul.mubr.bf16.gmra.mrb[12].mxu1 %v1545_v53 }
 0x134   :  { %1279 = vmatprep.mubr.bf16.mxu1 %v1485_v16 }
 0x1ee   :  { %v1217_v61 = vpop.f32.mrb[0].mxu1 }
 0x1ef   :  { %v369_v62 = vadd.f32 %v1217_v61, %v277_v60  ;;  %v360_v63 = vpop.f32.mrb[1].mxu1 }
 0x1f0   :  { %v361_v0 = vadd.f32 %v360_v63, %v277_v60  ;;  %v1218_v1 = vpop.f32.mrb[2].mxu1 }
 0x1f1   :  { %v372_v2 = vadd.f32 %v1218_v1, %v277_v60  ;;  %v363_v3 = vpop.f32.mrb[3].mxu1  ;;  %v425_v5 = vmax.f32 %v369_v62, 0.0  ;;  %v1392_v1 = vld [vmem:[%s1660_s4 + $0x8] sm:$0xff]  }
 0x1f2   :  { %v364_v4 = vadd.f32 %v363_v3, %v277_v60  ;;  %v423_v7 = vmax.f32 %v361_v0, 0.0  ;;  %v1391_v0 = vld [vmem:[%s1660_s4] sm:$0xff]  }
 0x1f3   :  { %v426_v6 = vmax.f32 %v372_v2, 0.0  ;;  %1295 = vmatprep.subr.bf16.mxu0 %v1391_v0  ;;  %v1394_v2 = vld [vmem:[%s1660_s4 + $0x18] sm:$0xff]   ;;  %v1395_v3 = vld [vmem:[%s1660_s4 + $0x20] sm:$0xff]  }
 0x1f4   :  { %v424_v8 = vmax.f32 %v364_v4, 0.0  ;;  %v1396_v4 = vld [vmem:[%s1660_s4 + $0x28] sm:$0xff]  }
 0x1f5   :  { %v440_v9 = vpack.c.bf16 %v426_v6, %v425_v5 }
 0x1f6   :  { %v439_v10 = vpack.c.bf16 %v424_v8, %v423_v7  ;;  %v1221_v11 = vpop.f32.mrb[4].mxu1 }
 0x1f7   :  { %v385_v12 = vadd.f32 %v1221_v11, %v277_v60  ;;  %v376_v13 = vpop.f32.mrb[5].mxu1 }
 0x1f8   :  { %v377_v14 = vadd.f32 %v376_v13, %v277_v60  ;;  %v1222_v15 = vpop.f32.mrb[6].mxu1  ;;  %1247 = vmatprep.mubr.bf16.mxu0 %v439_v10 }
 0x1f9   :  { %v388_v17 = vadd.f32 %v1222_v15, %v277_v60  ;;  %v379_v18 = vpop.f32.mrb[7].mxu1  ;;  %1248 = vmatmul.mubr.bf16.vlgmr.msra.gmra.mrb[16].mxu0 %v440_v9  ;;  %v429_v20 = vmax.f32 %v385_v12, 0.0 }
 0x1fa   :  { %v380_v19 = vadd.f32 %v379_v18, %v277_v60  ;;  %v427_v22 = vmax.f32 %v377_v14, 0.0  ;;  %1296 = vmatpush3.bf16.msra.mxu0 %v1391_v0 }
 0x1fb   :  { %v430_v21 = vmax.f32 %v388_v17, 0.0  ;;  %1297 = vmatprep.subr.bf16.mxu0 %v1392_v1 }
 0x1fc   :  { %v428_v23 = vmax.f32 %v380_v19, 0.0 }
 0x1fd   :  { %v442_v24 = vpack.c.bf16 %v430_v21, %v429_v20 }
 0x1fe   :  { %v441_v25 = vpack.c.bf16 %v428_v23, %v427_v22  ;;  %v1225_v26 = vpop.f32.mrb[8].mxu1  ;;  %1298 = vmatpush3.bf16.msra.mxu0 %v1392_v1 }
 0x1ff   :  { %v401_v27 = vadd.f32 %v1225_v26, %v277_v60  ;;  %v392_v28 = vpop.f32.mrb[9].mxu1 }
 0x200   :  { %v393_v29 = vadd.f32 %v392_v28, %v277_v60  ;;  %v1226_v30 = vpop.f32.mrb[10].mxu1  ;;  %1251 = vmatprep.mubr.bf16.mxu0 %v441_v25 }
 0x201   :  { %v404_v31 = vadd.f32 %v1226_v30, %v277_v60  ;;  %v395_v32 = vpop.f32.mrb[11].mxu1  ;;  %1252 = vmatmul.mubr.bf16.gmra.mrb[20].mxu0 %v442_v24  ;;  %v433_v34 = vmax.f32 %v401_v27, 0.0  ;;  %v1397_v30 = vld [vmem:[%s1660_s4 + $0x30] sm:$0xff]  }
 0x202   :  { %v396_v33 = vadd.f32 %v395_v32, %v277_v60  ;;  %v431_v36 = vmax.f32 %v393_v29, 0.0  ;;  %v618_v32 = vsub.s32 1, %v1555_v57 }
 0x203   :  { %v434_v35 = vmax.f32 %v404_v31, 0.0  ;;  %v1398_v31 = vld [vmem:[%s1660_s4 + $0x38] sm:$0xff]  }
 0x204   :  { %v432_v37 = vmax.f32 %v396_v33, 0.0  ;;  %v619_v33 = vrot.slane %v1561_v59, %v618_v32 }
 0x205   :  { %v444_v38 = vpack.c.bf16 %v434_v35, %v433_v34 }
 0x206   :  { %v443_v39 = vpack.c.bf16 %v432_v37, %v431_v36  ;;  %v1229_v40 = vpop.f32.mrb[12].mxu1 }
 0x207   :  { %v417_v41 = vadd.f32 %v1229_v40, %v277_v60  ;;  %v408_v42 = vpop.f32.mrb[13].mxu1 }
 0x208   :  { %v409_v43 = vadd.f32 %v408_v42, %v277_v60  ;;  %v1230_v44 = vpop.f32.mrb[14].mxu1  ;;  %1255 = vmatprep.mubr.bf16.mxu0 %v443_v39 }
 0x209   :  { %v420_v45 = vadd.f32 %v1230_v44, %v277_v60  ;;  %v411_v46 = vpop.f32.mrb[15].mxu1  ;;  %1256 = vmatmul.mubr.bf16.gmra.mrb[24].mxu0 %v444_v38  ;;  %v437_v55 = vmax.f32 %v417_v41, 0.0 }
 0x20a   :  { %v412_v54 = vadd.f32 %v411_v46, %v277_v60  ;;  %v435_v58 = vmax.f32 %v409_v43, 0.0  ;;  %v1393_v60 = vld [vmem:[%s1660_s4 + $0x10] sm:$0xff]  }
 0x20b   :  { %v438_v56 = vmax.f32 %v420_v45, 0.0  ;;  %1299 = vmatprep.subr.bf16.mxu0 %v1393_v60 }
 0x20c   :  { %v436_v61 = vmax.f32 %v412_v54, 0.0  ;;  %1300 = vmatpush3.bf16.msra.mxu0 %v1393_v60 }
 0x20d   :  { %v446_v62 = vpack.c.bf16 %v438_v56, %v437_v55  ;;  %1301 = vmatprep.subr.bf16.mxu0 %v1394_v2 }
 0x20e   :  { %v445_v63 = vpack.c.bf16 %v436_v61, %v435_v58 }
 0x210   :  { %1259 = vmatprep.mubr.bf16.mxu0 %v445_v63  ;;  %1302 = vmatpush3.bf16.msra.mxu0 %v1394_v2 }
 0x211   :  { %1260 = vmatmul.mubr.bf16.gmra.mrb[28].mxu0 %v446_v62  ;;  %1303 = vmatprep.subr.bf16.mxu0 %v1395_v3 }
 0x214   :  { %1304 = vmatpush3.bf16.msra.mxu0 %v1395_v3 }
 0x215   :  { %1305 = vmatprep.subr.bf16.mxu0 %v1396_v4 }
 0x218   :  { %1306 = vmatpush3.bf16.msra.mxu0 %v1396_v4 }
 0x219   :  { %1307 = vmatprep.subr.bf16.mxu0 %v1397_v30 }
 0x21c   :  { %1308 = vmatpush3.bf16.msra.mxu0 %v1397_v30 }
 0x21d   :  { %1309 = vmatprep.subr.bf16.mxu0 %v1398_v31 }
 0x220   :  { %1310 = vmatpush3.bf16.msra.mxu0 %v1398_v31 }
 0x2cc   :  { %v1249_v5 = vpop.f32.mrb[16].mxu0 }
 0x2cd   :  { %v545_v6 = vpop.f32.mrb[17].mxu0 }
 0x2ce   :  { %v1250_v7 = vpop.f32.mrb[18].mxu0 }
 0x2cf   :  { %v609_v8 = vpack.c.bf16 %v1250_v7, %v1249_v5  ;;  %v548_v9 = vpop.f32.mrb[19].mxu0 }
 0x2d0   :  { %v608_v10 = vpack.c.bf16 %v548_v9, %v545_v6 }
 0x2d2   :  { %1263 = vmatprep.subr.bf16.mxu1 %v608_v10 }
 0x2d3   :  { %1264 = vmatpush3.bf16.msra.mxu1 %v608_v10 }
 0x2d4   :  { %v1253_v11 = vpop.f32.mrb[20].mxu0  ;;  %1265 = vmatprep.subr.bf16.mxu1 %v609_v8 }
 0x2d5   :  { %v561_v12 = vpop.f32.mrb[21].mxu0 }
 0x2d6   :  { %v1254_v13 = vpop.f32.mrb[22].mxu0 }
 0x2d7   :  { %v611_v14 = vpack.c.bf16 %v1254_v13, %v1253_v11  ;;  %v564_v15 = vpop.f32.mrb[23].mxu0  ;;  %1266 = vmatpush3.bf16.msra.mxu1 %v609_v8 }
 0x2d8   :  { %v610_v17 = vpack.c.bf16 %v564_v15, %v561_v12 }
 0x2da   :  { %1267 = vmatprep.subr.bf16.mxu1 %v610_v17 }
 0x2db   :  { %1268 = vmatpush3.bf16.msra.mxu1 %v610_v17 }
 0x2dc   :  { %v1257_v18 = vpop.f32.mrb[24].mxu0  ;;  %1269 = vmatprep.subr.bf16.mxu1 %v611_v14 }
 0x2dd   :  { %v577_v19 = vpop.f32.mrb[25].mxu0 }
 0x2de   :  { %v1258_v20 = vpop.f32.mrb[26].mxu0 }
 0x2df   :  { %v613_v21 = vpack.c.bf16 %v1258_v20, %v1257_v18  ;;  %v580_v22 = vpop.f32.mrb[27].mxu0  ;;  %1270 = vmatpush3.bf16.msra.mxu1 %v611_v14 }
 0x2e0   :  { %v612_v23 = vpack.c.bf16 %v580_v22, %v577_v19 }
 0x2e2   :  { %1271 = vmatprep.subr.bf16.mxu1 %v612_v23 }
 0x2e3   :  { %1272 = vmatpush3.bf16.msra.mxu1 %v612_v23 }
 0x2e4   :  { %v1261_v24 = vpop.f32.mrb[28].mxu0  ;;  %1273 = vmatprep.subr.bf16.mxu1 %v613_v21 }
 0x2e5   :  { %v593_v25 = vpop.f32.mrb[29].mxu0 }
 0x2e6   :  { %v1262_v26 = vpop.f32.mrb[30].mxu0 }
 0x2e7   :  { %v615_v27 = vpack.c.bf16 %v1262_v26, %v1261_v24  ;;  %v596_v28 = vpop.f32.mrb[31].mxu0  ;;  %1274 = vmatpush3.bf16.msra.mxu1 %v613_v21 }
 0x2e8   :  { %v614_v29 = vpack.c.bf16 %v596_v28, %v593_v25 }
 0x2ea   :  { %1275 = vmatprep.subr.bf16.mxu1 %v614_v29 }
 0x2eb   :  { %1276 = vmatpush3.bf16.msra.mxu1 %v614_v29 }
 0x2ec   :  { %1277 = vmatprep.subr.bf16.mxu1 %v615_v27 }
 0x2ef   :  { %1278 = vmatpush3.bf16.msra.mxu1 %v615_v27 }
 0x2f2   :  { %1280 = vmatmul.mubr.bf16.vlgmr.msra.gmra.mrb[16].mxu1 %v1509_v47 }
 0x2f3   :  { %1283 = vmatprep.mubr.bf16.mxu1 %v1514_v48 }
 0x2fa   :  { %1284 = vmatmul.mubr.bf16.gmra.mrb[20].mxu1 %v1521_v49 }
 0x2fb   :  { %1287 = vmatprep.mubr.bf16.mxu1 %v1526_v50 }
 0x302   :  { %1288 = vmatmul.mubr.bf16.gmra.mrb[24].mxu1 %v1533_v51 }
 0x303   :  { %1291 = vmatprep.mubr.bf16.mxu1 %v1538_v52 }
 0x30a   :  { %1292 = vmatmul.mubr.bf16.gmra.mrb[28].mxu1 %v1545_v53 }
 0x30b   :  { %1343 = vmatprep.mubr.bf16.mxu1 %v1485_v16 }
 0x3c5   :  { %v1281_v34 = vpop.f32.mrb[16].mxu1 }
 0x3c6   :  { %v663_v35 = vadd.f32 %v1281_v34, %v619_v33  ;;  %v654_v36 = vpop.f32.mrb[17].mxu1 }
 0x3c7   :  { %v655_v16 = vadd.f32 %v654_v36, %v619_v33  ;;  %v1282_v37 = vpop.f32.mrb[18].mxu1 }
 0x3c8   :  { %v666_v38 = vadd.f32 %v1282_v37, %v619_v33  ;;  %v657_v39 = vpop.f32.mrb[19].mxu1  ;;  %v719_v41 = vmax.f32 %v663_v35, 0.0 }
 0x3c9   :  { %v658_v40 = vadd.f32 %v657_v39, %v619_v33  ;;  %v717_v43 = vmax.f32 %v655_v16, 0.0 }
 0x3ca   :  { %v720_v42 = vmax.f32 %v666_v38, 0.0 }
 0x3cb   :  { %v718_v44 = vmax.f32 %v658_v40, 0.0 }
 0x3cc   :  { %v734_v45 = vpack.c.bf16 %v720_v42, %v719_v41 }
 0x3cd   :  { %v733_v46 = vpack.c.bf16 %v718_v44, %v717_v43  ;;  %v1285_v54 = vpop.f32.mrb[20].mxu1 }
 0x3ce   :  { %v679_v55 = vadd.f32 %v1285_v54, %v619_v33  ;;  %v670_v56 = vpop.f32.mrb[21].mxu1 }
 0x3cf   :  { %v671_v58 = vadd.f32 %v670_v56, %v619_v33  ;;  %v1286_v61 = vpop.f32.mrb[22].mxu1  ;;  %1311 = vmatprep.mubr.bf16.mxu0 %v733_v46 }
 0x3d0   :  { %v682_v62 = vadd.f32 %v1286_v61, %v619_v33  ;;  %v673_v63 = vpop.f32.mrb[23].mxu1  ;;  %1312 = vmatmul.mubr.bf16.vlgmr.msra.gmra.mrb[32].mxu0 %v734_v45  ;;  %v723_v1 = vmax.f32 %v679_v55, 0.0 }
 0x3d1   :  { %v674_v0 = vadd.f32 %v673_v63, %v619_v33  ;;  %v721_v2 = vmax.f32 %v671_v58, 0.0 }
 0x3d2   :  { %v724_v60 = vmax.f32 %v682_v62, 0.0 }
 0x3d3   :  { %v722_v3 = vmax.f32 %v674_v0, 0.0 }
 0x3d4   :  { %v736_v4 = vpack.c.bf16 %v724_v60, %v723_v1 }
 0x3d5   :  { %v735_v5 = vpack.c.bf16 %v722_v3, %v721_v2  ;;  %v1289_v6 = vpop.f32.mrb[24].mxu1  ;;  %v912_v3 = vsub.s32 2, %v1555_v57 }
 0x3d6   :  { %v695_v7 = vadd.f32 %v1289_v6, %v619_v33  ;;  %v686_v8 = vpop.f32.mrb[25].mxu1 }
 0x3d7   :  { %v687_v9 = vadd.f32 %v686_v8, %v619_v33  ;;  %v1290_v10 = vpop.f32.mrb[26].mxu1  ;;  %1315 = vmatprep.mubr.bf16.mxu0 %v735_v5 }
 0x3d8   :  { %v698_v11 = vadd.f32 %v1290_v10, %v619_v33  ;;  %v689_v12 = vpop.f32.mrb[27].mxu1  ;;  %1316 = vmatmul.mubr.bf16.gmra.mrb[36].mxu0 %v736_v4  ;;  %v727_v14 = vmax.f32 %v695_v7, 0.0  ;;  %v913_v4 = vrot.slane %v1561_v59, %v912_v3 }
 0x3d9   :  { %v690_v13 = vadd.f32 %v689_v12, %v619_v33  ;;  %v725_v17 = vmax.f32 %v687_v9, 0.0 }
 0x3da   :  { %v728_v15 = vmax.f32 %v698_v11, 0.0 }
 0x3db   :  { %v726_v18 = vmax.f32 %v690_v13, 0.0 }
 0x3dc   :  { %v738_v19 = vpack.c.bf16 %v728_v15, %v727_v14 }
 0x3dd   :  { %v737_v20 = vpack.c.bf16 %v726_v18, %v725_v17  ;;  %v1293_v21 = vpop.f32.mrb[28].mxu1 }
 0x3de   :  { %v711_v22 = vadd.f32 %v1293_v21, %v619_v33  ;;  %v702_v23 = vpop.f32.mrb[29].mxu1 }
 0x3df   :  { %v703_v24 = vadd.f32 %v702_v23, %v619_v33  ;;  %v1294_v25 = vpop.f32.mrb[30].mxu1  ;;  %1319 = vmatprep.mubr.bf16.mxu0 %v737_v20 }
 0x3e0   :  { %v714_v26 = vadd.f32 %v1294_v25, %v619_v33  ;;  %v705_v27 = vpop.f32.mrb[31].mxu1  ;;  %1320 = vmatmul.mubr.bf16.gmra.mrb[40].mxu0 %v738_v19  ;;  %v731_v29 = vmax.f32 %v711_v22, 0.0 }
 0x3e1   :  { %v706_v28 = vadd.f32 %v705_v27, %v619_v33  ;;  %v729_v31 = vmax.f32 %v703_v24, 0.0 }
 0x3e2   :  { %v732_v30 = vmax.f32 %v714_v26, 0.0 }
 0x3e3   :  { %v730_v32 = vmax.f32 %v706_v28, 0.0 }
 0x3e4   :  { %v740_v34 = vpack.c.bf16 %v732_v30, %v731_v29 }
 0x3e5   :  { %v739_v35 = vpack.c.bf16 %v730_v32, %v729_v31 }
 0x3e7   :  { %1323 = vmatprep.mubr.bf16.mxu0 %v739_v35 }
 0x3e8   :  { %1324 = vmatmul.mubr.bf16.gmra.mrb[44].mxu0 %v740_v34 }
 0x4a3   :  { %v1313_v36 = vpop.f32.mrb[32].mxu0 }
 0x4a4   :  { %v839_v16 = vpop.f32.mrb[33].mxu0 }
 0x4a5   :  { %v1314_v37 = vpop.f32.mrb[34].mxu0 }
 0x4a6   :  { %v903_v38 = vpack.c.bf16 %v1314_v37, %v1313_v36  ;;  %v842_v39 = vpop.f32.mrb[35].mxu0 }
 0x4a7   :  { %v902_v40 = vpack.c.bf16 %v842_v39, %v839_v16 }
 0x4a9   :  { %1327 = vmatprep.subr.bf16.mxu1 %v902_v40 }
 0x4aa   :  { %1328 = vmatpush3.bf16.msra.mxu1 %v902_v40 }
 0x4ab   :  { %v1317_v41 = vpop.f32.mrb[36].mxu0  ;;  %1329 = vmatprep.subr.bf16.mxu1 %v903_v38 }
 0x4ac   :  { %v855_v42 = vpop.f32.mrb[37].mxu0 }
 0x4ad   :  { %v1318_v33 = vpop.f32.mrb[38].mxu0 }
 0x4ae   :  { %v905_v43 = vpack.c.bf16 %v1318_v33, %v1317_v41  ;;  %v858_v44 = vpop.f32.mrb[39].mxu0  ;;  %1330 = vmatpush3.bf16.msra.mxu1 %v903_v38 }
 0x4af   :  { %v904_v45 = vpack.c.bf16 %v858_v44, %v855_v42 }
 0x4b1   :  { %1331 = vmatprep.subr.bf16.mxu1 %v904_v45 }
 0x4b2   :  { %1332 = vmatpush3.bf16.msra.mxu1 %v904_v45 }
 0x4b3   :  { %v1321_v46 = vpop.f32.mrb[40].mxu0  ;;  %1333 = vmatprep.subr.bf16.mxu1 %v905_v43 }
 0x4b4   :  { %v871_v54 = vpop.f32.mrb[41].mxu0 }
 0x4b5   :  { %v1322_v55 = vpop.f32.mrb[42].mxu0 }
 0x4b6   :  { %v907_v56 = vpack.c.bf16 %v1322_v55, %v1321_v46  ;;  %v874_v58 = vpop.f32.mrb[43].mxu0  ;;  %1334 = vmatpush3.bf16.msra.mxu1 %v905_v43 }
 0x4b7   :  { %v906_v61 = vpack.c.bf16 %v874_v58, %v871_v54 }
 0x4b9   :  { %1335 = vmatprep.subr.bf16.mxu1 %v906_v61 }
 0x4ba   :  { %1336 = vmatpush3.bf16.msra.mxu1 %v906_v61 }
 0x4bb   :  { %v1325_v62 = vpop.f32.mrb[44].mxu0  ;;  %1337 = vmatprep.subr.bf16.mxu1 %v907_v56 }
 0x4bc   :  { %v887_v63 = vpop.f32.mrb[45].mxu0 }
 0x4bd   :  { %v1326_v0 = vpop.f32.mrb[46].mxu0 }
 0x4be   :  { %v909_v1 = vpack.c.bf16 %v1326_v0, %v1325_v62  ;;  %v890_v60 = vpop.f32.mrb[47].mxu0  ;;  %1338 = vmatpush3.bf16.msra.mxu1 %v907_v56 }
 0x4bf   :  { %v908_v2 = vpack.c.bf16 %v890_v60, %v887_v63 }
 0x4c1   :  { %1339 = vmatprep.subr.bf16.mxu1 %v908_v2 }
 0x4c2   :  { %1340 = vmatpush3.bf16.msra.mxu1 %v908_v2 }
 0x4c3   :  { %1341 = vmatprep.subr.bf16.mxu1 %v909_v1 }
 0x4c6   :  { %1342 = vmatpush3.bf16.msra.mxu1 %v909_v1 }
 0x4c9   :  { %1344 = vmatmul.mubr.bf16.vlgmr.msra.gmra.mrb[32].mxu1 %v1509_v47 }
 0x4ca   :  { %1347 = vmatprep.mubr.bf16.mxu1 %v1514_v48 }
 0x4d1   :  { %1348 = vmatmul.mubr.bf16.gmra.mrb[36].mxu1 %v1521_v49 }
 0x4d2   :  { %1351 = vmatprep.mubr.bf16.mxu1 %v1526_v50 }
 0x4d9   :  { %1352 = vmatmul.mubr.bf16.gmra.mrb[40].mxu1 %v1533_v51 }
 0x4da   :  { %1355 = vmatprep.mubr.bf16.mxu1 %v1538_v52 }
 0x4e1   :  { %1356 = vmatmul.mubr.bf16.gmra.mrb[44].mxu1 %v1545_v53 }
 0x59c   :  { %v1345_v5 = vpop.f32.mrb[32].mxu1 }
 0x59d   :  { %v957_v6 = vadd.f32 %v1345_v5, %v913_v4  ;;  %v948_v7 = vpop.f32.mrb[33].mxu1 }
 0x59e   :  { %v949_v47 = vadd.f32 %v948_v7, %v913_v4  ;;  %v1346_v8 = vpop.f32.mrb[34].mxu1 }
 0x59f   :  { %1013 = vst [vmem:[%s1661_s6 + $0x10] sm:$0xff] %v957_v6  ;;  %v960_v48 = vadd.f32 %v1346_v8, %v913_v4  ;;  %v951_v49 = vpop.f32.mrb[35].mxu1 }
 0x5a0   :  { %1011 = vst [vmem:[%s1661_s6] sm:$0xff] %v949_v47  ;;  %v952_v50 = vadd.f32 %v951_v49, %v913_v4 }
 0x5a1   :  { %1014 = vst [vmem:[%s1661_s6 + $0x18] sm:$0xff] %v960_v48 }
 0x5a2   :  { %1012 = vst [vmem:[%s1661_s6 + $0x8] sm:$0xff] %v952_v50 }
 0x5a4   :  { %v1349_v51 = vpop.f32.mrb[36].mxu1 }
 0x5a5   :  { %v973_v52 = vadd.f32 %v1349_v51, %v913_v4  ;;  %v964_v53 = vpop.f32.mrb[37].mxu1 }
 0x5a6   :  { %v965_v57 = vadd.f32 %v964_v53, %v913_v4  ;;  %v1350_v59 = vpop.f32.mrb[38].mxu1 }
 0x5a7   :  { %1017 = vst [vmem:[%s1661_s6 + $0x30] sm:$0xff] %v973_v52  ;;  %v976_v9 = vadd.f32 %v1350_v59, %v913_v4  ;;  %v967_v10 = vpop.f32.mrb[39].mxu1 }
 0x5a8   :  { %1015 = vst [vmem:[%s1661_s6 + $0x20] sm:$0xff] %v965_v57  ;;  %v968_v11 = vadd.f32 %v967_v10, %v913_v4 }
 0x5a9   :  { %1018 = vst [vmem:[%s1661_s6 + $0x38] sm:$0xff] %v976_v9 }
 0x5aa   :  { %1016 = vst [vmem:[%s1661_s6 + $0x28] sm:$0xff] %v968_v11 }
 0x5ac   :  { %v1353_v12 = vpop.f32.mrb[40].mxu1 }
 0x5ad   :  { %v989_v13 = vadd.f32 %v1353_v12, %v913_v4  ;;  %v980_v14 = vpop.f32.mrb[41].mxu1 }
 0x5ae   :  { %v981_v15 = vadd.f32 %v980_v14, %v913_v4  ;;  %v1354_v17 = vpop.f32.mrb[42].mxu1 }
 0x5af   :  { %1021 = vst [vmem:[%s1661_s6 + $0x50] sm:$0xff] %v989_v13  ;;  %v992_v18 = vadd.f32 %v1354_v17, %v913_v4  ;;  %v983_v19 = vpop.f32.mrb[43].mxu1 }
 0x5b0   :  { %1019 = vst [vmem:[%s1661_s6 + $0x40] sm:$0xff] %v981_v15  ;;  %v984_v20 = vadd.f32 %v983_v19, %v913_v4 }
 0x5b1   :  { %1022 = vst [vmem:[%s1661_s6 + $0x58] sm:$0xff] %v992_v18 }
 0x5b2   :  { %1020 = vst [vmem:[%s1661_s6 + $0x48] sm:$0xff] %v984_v20 }
 0x5b4   :  { %v1357_v21 = vpop.f32.mrb[44].mxu1 }
 0x5b5   :  { %v1005_v22 = vadd.f32 %v1357_v21, %v913_v4  ;;  %v996_v23 = vpop.f32.mrb[45].mxu1 }
 0x5b6   :  { %v997_v24 = vadd.f32 %v996_v23, %v913_v4  ;;  %v1358_v25 = vpop.f32.mrb[46].mxu1 }
 0x5b7   :  { %1025 = vst [vmem:[%s1661_s6 + $0x70] sm:$0xff] %v1005_v22  ;;  %v1008_v26 = vadd.f32 %v1358_v25, %v913_v4  ;;  %v999_v27 = vpop.f32.mrb[47].mxu1 }
 0x5b8   :  { %1023 = vst [vmem:[%s1661_s6 + $0x60] sm:$0xff] %v997_v24  ;;  %v1000_v28 = vadd.f32 %v999_v27, %v913_v4 }
 0x5b9   :  { %1026 = vst [vmem:[%s1661_s6 + $0x78] sm:$0xff] %v1008_v26 }
 0x5ba   :  { %1024 = vst [vmem:[%s1661_s6 + $0x68] sm:$0xff] %v1000_v28 }

</bundles_post_ra>
